<compile_context>
chip_gen: v7x
topology: tpu7x:2x2x1
jax: 0.10.0
libtpu: 0.0.40
codegen_flags: <defaults>
</compile_context>

<pallas_src>
import functools

import jax
import jax.numpy as jnp
from jax import lax
from jax.experimental import pallas as pl
from jax.experimental.pallas import tpu as pltpu


def _ce_acc_kernel(logits_ref, labels_ref, wvec_ref, out_ref,
                   wnll_acc, wsum_acc, corr_acc,
                   *, n_total, blocks_per_split):
    p = pl.program_id(0)          # split (TensorCore) index
    b = pl.program_id(1)          # block index within the split

    @pl.when(b == 0)
    def _():
        wnll_acc[...] = jnp.zeros_like(wnll_acc)
        wsum_acc[...] = jnp.zeros_like(wsum_acc)
        corr_acc[...] = jnp.zeros_like(corr_acc)

    logits = logits_ref[...].astype(jnp.float32)          # (TB, C)
    labels = labels_ref[...]                              # (TB, 1) int32
    tb, c = logits.shape

    # Row-validity mask (handles the ragged last tile and fully out-of-range blocks).
    row0 = (p * blocks_per_split + b) * tb
    row = row0 + lax.broadcasted_iota(jnp.int32, (tb, 1), 0)
    valid = row < n_total                                  # (TB, 1) bool

    col = lax.broadcasted_iota(jnp.int32, (tb, c), 1)      # class index per lane
    onehot = col == labels                                 # (TB, C) bool

    # Numerically-stable log-softmax pieces (per-row / lane reductions only).
    m = jnp.max(logits, axis=1, keepdims=True)                               # (TB, 1)
    lse = jnp.log(jnp.sum(jnp.exp(logits - m), axis=1, keepdims=True)) + m   # (TB, 1)
    true_logit = jnp.sum(jnp.where(onehot, logits, 0.0), axis=1, keepdims=True)
    nll = lse - true_logit                                                   # (TB, 1)

    # Per-sample class weight w[y_i] via masked lane-sum (no gather needed).
    w = jnp.sum(jnp.where(onehot, wvec_ref[...].astype(jnp.float32), 0.0),
                axis=1, keepdims=True)                                       # (TB, 1)

    # argmax with first-max tie-break (matches torch.argmax along dim=1).
    is_max = logits == m
    pred = jnp.min(jnp.where(is_max, col, c), axis=1, keepdims=True)
    correct = (pred == labels).astype(jnp.float32)

    # VPU-only per-step accumulation into VMEM vector accumulators (masked rows -> 0).
    wnll_acc[...] += jnp.where(valid, w * nll, 0.0)
    wsum_acc[...] += jnp.where(valid, w, 0.0)
    corr_acc[...] += jnp.where(valid, correct, 0.0)

    # Single cross-sublane reduction in the epilogue; emit per-split partial sums.
    @pl.when(b == pl.num_programs(1) - 1)
    def _():
        out_ref[0, 0] = jnp.sum(wnll_acc[...])   # sum_i w[y_i] * nll_i
        out_ref[0, 1] = jnp.sum(wsum_acc[...])   # sum_i w[y_i]
        out_ref[0, 2] = jnp.sum(corr_acc[...])   # number of correct predictions


def classification_loss(y_pred, y_true, class_weight=None, *,
                        batch_tile=None, num_splits=2,
                        vmem_budget_bytes=10 * 1024 * 1024):
    """Pallas implementation of ClassificationLoss.forward (criterion = cross-entropy).

    y_pred: [N, C] logits (f32 or bf16 — streamed in native dtype)
    y_true: [N]    integer class indices
    class_weight: optional [C] (CrossEntropyLoss `weight=`); None -> ones.
    Returns (loss_scalar, {'loss': loss_scalar, 'acc': acc_scalar})  (device scalars).
    """
    n, c = y_pred.shape
    itemsize = jnp.dtype(y_pred.dtype).itemsize
    if class_weight is None:
        class_weight = jnp.ones((c,), jnp.float32)

    # Pick the largest batch tile that keeps double-buffered logits inside the VMEM budget.
    if batch_tile is None:
        bt = vmem_budget_bytes // max(1, 2 * c * itemsize)
        batch_tile = int(max(16, min(2048, bt)))
    # Multiple of 16 (covers f32 and bf16 sublane packing).
    batch_tile = max(16, (batch_tile // 16) * 16)
    # Never exceed the batch: a full-dim block is always a legal BlockSpec shape.
    if batch_tile >= n:
        batch_tile = n

    n_blocks = pl.cdiv(n, batch_tile)
    num_splits = max(1, min(num_splits, n_blocks))       # >1 uses both TCs on v7x
    blocks_per_split = pl.cdiv(n_blocks, num_splits)

    labels2d = y_true.astype(jnp.int32).reshape(n, 1)
    wvec = class_weight.astype(jnp.float32).reshape(1, c)

    def row_block(p, b):
        # Clamp so out-of-range blocks (ragged split) read valid memory; their rows are
        # masked out inside the kernel via the global row index.
        return jnp.minimum(p * blocks_per_split + b, n_blocks - 1)

    kernel = functools.partial(_ce_acc_kernel, n_total=n,
                               blocks_per_split=blocks_per_split)

    cost = pl.CostEstimate(
        flops=5 * n * c,
        transcendentals=n * c,
        bytes_accessed=n * c * itemsize + n * 4 + c * 4 + num_splits * 3 * 4,
    )

    partial_sums = pl.pallas_call(
        kernel,
        out_shape=jax.ShapeDtypeStruct((num_splits, 3), jnp.float32),
        grid_spec=pltpu.PrefetchScalarGridSpec(
            num_scalar_prefetch=0,
            grid=(num_splits, blocks_per_split),
            in_specs=[
                pl.BlockSpec((batch_tile, c), lambda p, b: (row_block(p, b), 0)),
                pl.BlockSpec((batch_tile, 1), lambda p, b: (row_block(p, b), 0)),
                pl.BlockSpec((1, c), lambda p, b: (0, 0)),
            ],
            out_specs=pl.BlockSpec((1, 3), lambda p, b: (p, 0),
                                   memory_space=pltpu.MemorySpace.SMEM),
            scratch_shapes=[
                pltpu.VMEM((batch_tile, 1), jnp.float32),   # sum w*nll per row-slot
                pltpu.VMEM((batch_tile, 1), jnp.float32),   # sum w per row-slot
                pltpu.VMEM((batch_tile, 1), jnp.float32),   # correct count per row-slot
            ],
        ),
        compiler_params=pltpu.CompilerParams(
            dimension_semantics=("parallel", "arbitrary"),
            vmem_limit_bytes=32 * 1024 * 1024),
        cost_estimate=cost,
    )(y_pred, labels2d, wvec)

    wnll_total = jnp.sum(partial_sums[:, 0])
    wsum_total = jnp.sum(partial_sums[:, 1])
    correct_total = jnp.sum(partial_sums[:, 2])

    loss = wnll_total / wsum_total
    acc = correct_total / jnp.float32(n)

    # TODO(synk): the original module calls loss.item() here (host sync). We return
    # device scalars so the whole step stays jittable / fusable.
    evaluators = {"loss": loss, "acc": acc}
    return loss, evaluators


def _reference(y_pred, y_true, class_weight):
    # pure-JAX reference of CrossEntropyLoss(weight=w) + accuracy
    logp = jax.nn.log_softmax(y_pred.astype(jnp.float32), axis=-1)
    nll = -jnp.take_along_axis(logp, y_true[:, None], axis=1)[:, 0]
    w = class_weight[y_true]
    loss = jnp.sum(w * nll) / jnp.sum(w)
    acc = jnp.mean((jnp.argmax(y_pred, axis=1) == y_true).astype(jnp.float32))
    return loss, acc


if __name__ == "__main__":
    key = jax.random.PRNGKey(0)
    k1, k2 = jax.random.split(key)

    # Case 1: weighted CE, auto-picked tile (single full-dim block).
    N, C = 24, 32
    y_pred = jax.random.normal(k1, (N, C), jnp.float32)
    y_true = jax.random.randint(k2, (N,), 0, C, jnp.int32)
    class_weight = 1.0 + 0.01 * jnp.arange(C, dtype=jnp.float32)

    loss, evaluators = classification_loss(y_pred, y_true, class_weight)
    loss = jax.block_until_ready(loss)
    ref_loss, ref_acc = _reference(y_pred, y_true, class_weight)
    assert abs(float(loss) - float(ref_loss)) < 1e-4, (float(loss), float(ref_loss))
    assert abs(float(evaluators["acc"]) - float(ref_acc)) < 1e-6

    # Case 2: unweighted CE, ragged batch, odd class count, explicit small tile
    # (exercises the 2-split grid, a partial block, and a clamped out-of-range block).
    N2, C2 = 40, 7
    k3, k4 = jax.random.split(k2)
    y_pred2 = jax.random.normal(k3, (N2, C2), jnp.float32)
    y_true2 = jax.random.randint(k4, (N2,), 0, C2, jnp.int32)

    loss2, evaluators2 = classification_loss(y_pred2, y_true2, None, batch_tile=16)
    loss2 = jax.block_until_ready(loss2)
    ref_loss2, ref_acc2 = _reference(y_pred2, y_true2, jnp.ones((C2,), jnp.float32))
    assert abs(float(loss2) - float(ref_loss2)) < 1e-4, (float(loss2), float(ref_loss2))
    assert abs(float(evaluators2["acc"]) - float(ref_acc2)) < 1e-6

    # Case 3: bf16 logits streamed in native dtype (in-kernel f32 cast).
    N3, C3 = 32, 16
    k5, k6 = jax.random.split(k4)
    y_pred3 = jax.random.normal(k5, (N3, C3), jnp.float32).astype(jnp.bfloat16)
    y_true3 = jax.random.randint(k6, (N3,), 0, C3, jnp.int32)

    loss3, evaluators3 = classification_loss(y_pred3, y_true3, None)
    loss3 = jax.block_until_ready(loss3)
    ref_loss3, ref_acc3 = _reference(y_pred3, y_true3, jnp.ones((C3,), jnp.float32))
    assert abs(float(loss3) - float(ref_loss3)) < 1e-3, (float(loss3), float(ref_loss3))
    assert abs(float(evaluators3["acc"]) - float(ref_acc3)) < 1e-6

    print("KERNEL_OK")
</pallas_src>

<mosaic_0001>
module attributes {stable_mosaic.version = 11 : i64} {
  func.func @_ce_acc_kernel(%arg0: i32, %arg1: i32, %arg2: memref<24x32xf32, #tpu.memory_space<vmem>>, %arg3: memref<24x1xi32, #tpu.memory_space<vmem>>, %arg4: memref<1x32xf32, #tpu.memory_space<vmem>>, %arg5: memref<1x3xf32, #tpu.memory_space<smem>>, %arg6: memref<24x1xf32, #tpu.memory_space<vmem>>, %arg7: memref<24x1xf32, #tpu.memory_space<vmem>>, %arg8: memref<24x1xf32, #tpu.memory_space<vmem>>) attributes {dimension_semantics = [#tpu.dimension_semantics<parallel>, #tpu.dimension_semantics<arbitrary>], iteration_bounds = array<i64: 1, 1>, scalar_prefetch = 0 : i64, scratch_operands = 3 : i64, tpu.core_type = #tpu.core_type<tc>, window_params = [{transform_indices = @transform_0, window_bounds = array<i64: 24, 32>}, {transform_indices = @transform_1, window_bounds = array<i64: 24, 1>}, {pipeline_mode = #tpu.pipeline_mode<synchronous>, transform_indices = @transform_2, window_bounds = array<i64: 1, 32>}, {transform_indices = @transform_3, window_bounds = array<i64: 1, 3>}]} {
    %c0_i32 = arith.constant 0 : i32
    %0 = arith.cmpi eq, %arg1, %c0_i32 : i32
    %1 = arith.extui %0 : i1 to i32
    %c0_i32_0 = arith.constant 0 : i32
    %2 = arith.cmpi ne, %1, %c0_i32_0 : i32
    scf.if %2 {
      %cst_30 = arith.constant 0.000000e+00 : f32
      %65 = vector.broadcast %cst_30 : f32 to vector<24x1xf32>
      %c0_31 = arith.constant 0 : index
      %c0_32 = arith.constant 0 : index
      %66 = vector.load %arg6[%c0_31, %c0_32] : memref<24x1xf32, #tpu.memory_space<vmem>>, vector<24x1xf32>
      tpu.vector_store %arg6[%c0_31, %c0_32], %65 {strides = array<i32>} : memref<24x1xf32, #tpu.memory_space<vmem>>, vector<24x1xf32>,
      %cst_33 = arith.constant 0.000000e+00 : f32
      %67 = vector.broadcast %cst_33 : f32 to vector<24x1xf32>
      %c0_34 = arith.constant 0 : index
      %c0_35 = arith.constant 0 : index
      %68 = vector.load %arg7[%c0_34, %c0_35] : memref<24x1xf32, #tpu.memory_space<vmem>>, vector<24x1xf32>
      tpu.vector_store %arg7[%c0_34, %c0_35], %67 {strides = array<i32>} : memref<24x1xf32, #tpu.memory_space<vmem>>, vector<24x1xf32>,
      %cst_36 = arith.constant 0.000000e+00 : f32
      %69 = vector.broadcast %cst_36 : f32 to vector<24x1xf32>
      %c0_37 = arith.constant 0 : index
      %c0_38 = arith.constant 0 : index
      %70 = vector.load %arg8[%c0_37, %c0_38] : memref<24x1xf32, #tpu.memory_space<vmem>>, vector<24x1xf32>
      tpu.vector_store %arg8[%c0_37, %c0_38], %69 {strides = array<i32>} : memref<24x1xf32, #tpu.memory_space<vmem>>, vector<24x1xf32>,
    } else {
    }
    %c0 = arith.constant 0 : index
    %c0_1 = arith.constant 0 : index
    %3 = vector.load %arg2[%c0, %c0_1] : memref<24x32xf32, #tpu.memory_space<vmem>>, vector<24x32xf32>
    %c0_2 = arith.constant 0 : index
    %c0_3 = arith.constant 0 : index
    %4 = vector.load %arg3[%c0_2, %c0_3] : memref<24x1xi32, #tpu.memory_space<vmem>>, vector<24x1xi32>
    %c1_i32 = arith.constant 1 : i32
    %5 = arith.muli %arg0, %c1_i32 : i32
    %6 = arith.addi %5, %arg1 : i32
    %c24_i32 = arith.constant 24 : i32
    %7 = arith.muli %6, %c24_i32 : i32
    %8 = tpu.iota {dimensions = array<i32: 0>} : vector<24x1xi32>
    %9 = vector.broadcast %7 : i32 to vector<24x1xi32>
    %10 = arith.addi %9, %8 : vector<24x1xi32>
    %c24_i32_4 = arith.constant 24 : i32
    %11 = vector.broadcast %c24_i32_4 : i32 to vector<24x1xi32>
    %12 = arith.cmpi slt, %10, %11 : vector<24x1xi32>
    %13 = tpu.iota {dimensions = array<i32: 1>} : vector<24x32xi32>
    %14 = vector.broadcast %4 : vector<24x1xi32> to vector<24x32xi32>
    %15 = arith.cmpi eq, %13, %14 : vector<24x32xi32>
    %cst = arith.constant dense<0xFF800000> : vector<24xf32>
    %16 = vector.multi_reduction <maximumf>, %3, %cst [1] : vector<24x32xf32> to vector<24xf32>
    %17 = vector.shape_cast %16 : vector<24xf32> to vector<24x1xf32>
    %18 = vector.broadcast %17 : vector<24x1xf32> to vector<24x32xf32>
    %19 = arith.subf %3, %18 : vector<24x32xf32>
    %20 = math.exp %19 : vector<24x32xf32>
    %cst_5 = arith.constant dense<0.000000e+00> : vector<24xf32>
    %21 = vector.multi_reduction <add>, %20, %cst_5 [1] : vector<24x32xf32> to vector<24xf32>
    %22 = vector.shape_cast %21 : vector<24xf32> to vector<24x1xf32>
    %23 = math.log %22 : vector<24x1xf32>
    %24 = arith.addf %23, %17 : vector<24x1xf32>
    %cst_6 = arith.constant 0.000000e+00 : f32
    %25 = vector.broadcast %cst_6 : f32 to vector<24x32xf32>
    %26 = arith.select %15, %3, %25 : vector<24x32xi1>, vector<24x32xf32>
    %cst_7 = arith.constant dense<0.000000e+00> : vector<24xf32>
    %27 = vector.multi_reduction <add>, %26, %cst_7 [1] : vector<24x32xf32> to vector<24xf32>
    %28 = vector.shape_cast %27 : vector<24xf32> to vector<24x1xf32>
    %29 = arith.subf %24, %28 : vector<24x1xf32>
    %c0_8 = arith.constant 0 : index
    %c0_9 = arith.constant 0 : index
    %30 = vector.load %arg4[%c0_8, %c0_9] : memref<1x32xf32, #tpu.memory_space<vmem>>, vector<1x32xf32>
    %cst_10 = arith.constant 0.000000e+00 : f32
    %31 = vector.shape_cast %30 : vector<1x32xf32> to vector<1x32xf32>
    %32 = vector.broadcast %31 : vector<1x32xf32> to vector<24x32xf32>
    %33 = vector.broadcast %cst_10 : f32 to vector<24x32xf32>
    %34 = arith.select %15, %32, %33 : vector<24x32xi1>, vector<24x32xf32>
    %cst_11 = arith.constant dense<0.000000e+00> : vector<24xf32>
    %35 = vector.multi_reduction <add>, %34, %cst_11 [1] : vector<24x32xf32> to vector<24xf32>
    %36 = vector.shape_cast %35 : vector<24xf32> to vector<24x1xf32>
    %37 = vector.broadcast %17 : vector<24x1xf32> to vector<24x32xf32>
    %38 = arith.cmpf oeq, %3, %37 : vector<24x32xf32>
    %c32_i32 = arith.constant 32 : i32
    %39 = vector.broadcast %c32_i32 : i32 to vector<24x32xi32>
    %40 = arith.select %38, %13, %39 : vector<24x32xi1>, vector<24x32xi32>
    %cst_12 = arith.constant dense<2147483647> : vector<24xi32>
    %41 = vector.multi_reduction <minsi>, %40, %cst_12 [1] : vector<24x32xi32> to vector<24xi32>
    %42 = vector.shape_cast %41 : vector<24xi32> to vector<24x1xi32>
    %43 = arith.cmpi eq, %42, %4 : vector<24x1xi32>
    %44 = arith.extui %43 : vector<24x1xi1> to vector<24x1xi32>
    %45 = arith.sitofp %44 : vector<24x1xi32> to vector<24x1xf32>
    %c0_13 = arith.constant 0 : index
    %c0_14 = arith.constant 0 : index
    %46 = vector.load %arg6[%c0_13, %c0_14] : memref<24x1xf32, #tpu.memory_space<vmem>>, vector<24x1xf32>
    %47 = arith.mulf %36, %29 : vector<24x1xf32>
    %cst_15 = arith.constant 0.000000e+00 : f32
    %48 = vector.broadcast %cst_15 : f32 to vector<24x1xf32>
    %49 = arith.select %12, %47, %48 : vector<24x1xi1>, vector<24x1xf32>
    %50 = arith.addf %46, %49 : vector<24x1xf32>
    %c0_16 = arith.constant 0 : index
    %c0_17 = arith.constant 0 : index
    %51 = vector.load %arg6[%c0_16, %c0_17] : memref<24x1xf32, #tpu.memory_space<vmem>>, vector<24x1xf32>
    tpu.vector_store %arg6[%c0_16, %c0_17], %50 {strides = array<i32>} : memref<24x1xf32, #tpu.memory_space<vmem>>, vector<24x1xf32>,
    %c0_18 = arith.constant 0 : index
    %c0_19 = arith.constant 0 : index
    %52 = vector.load %arg7[%c0_18, %c0_19] : memref<24x1xf32, #tpu.memory_space<vmem>>, vector<24x1xf32>
    %cst_20 = arith.constant 0.000000e+00 : f32
    %53 = vector.broadcast %cst_20 : f32 to vector<24x1xf32>
    %54 = arith.select %12, %36, %53 : vector<24x1xi1>, vector<24x1xf32>
    %55 = arith.addf %52, %54 : vector<24x1xf32>
    %c0_21 = arith.constant 0 : index
    %c0_22 = arith.constant 0 : index
    %56 = vector.load %arg7[%c0_21, %c0_22] : memref<24x1xf32, #tpu.memory_space<vmem>>, vector<24x1xf32>
    tpu.vector_store %arg7[%c0_21, %c0_22], %55 {strides = array<i32>} : memref<24x1xf32, #tpu.memory_space<vmem>>, vector<24x1xf32>,
    %c0_23 = arith.constant 0 : index
    %c0_24 = arith.constant 0 : index
    %57 = vector.load %arg8[%c0_23, %c0_24] : memref<24x1xf32, #tpu.memory_space<vmem>>, vector<24x1xf32>
    %cst_25 = arith.constant 0.000000e+00 : f32
    %58 = vector.broadcast %cst_25 : f32 to vector<24x1xf32>
    %59 = arith.select %12, %45, %58 : vector<24x1xi1>, vector<24x1xf32>
    %60 = arith.addf %57, %59 : vector<24x1xf32>
    %c0_26 = arith.constant 0 : index
    %c0_27 = arith.constant 0 : index
    %61 = vector.load %arg8[%c0_26, %c0_27] : memref<24x1xf32, #tpu.memory_space<vmem>>, vector<24x1xf32>
    tpu.vector_store %arg8[%c0_26, %c0_27], %60 {strides = array<i32>} : memref<24x1xf32, #tpu.memory_space<vmem>>, vector<24x1xf32>,
    %c0_i32_28 = arith.constant 0 : i32
    %62 = arith.cmpi eq, %arg1, %c0_i32_28 : i32
    %63 = arith.extui %62 : i1 to i32
    %c0_i32_29 = arith.constant 0 : i32
    %64 = arith.cmpi ne, %63, %c0_i32_29 : i32
    scf.if %64 {
      %c0_30 = arith.constant 0 : index
      %c0_31 = arith.constant 0 : index
      %65 = vector.load %arg6[%c0_30, %c0_31] : memref<24x1xf32, #tpu.memory_space<vmem>>, vector<24x1xf32>
      %66 = vector.shape_cast %65 : vector<24x1xf32> to vector<1x24x1xf32>
      %cst_32 = arith.constant dense<0.000000e+00> : vector<1xf32>
      %67 = vector.multi_reduction <add>, %66, %cst_32 [1, 2] : vector<1x24x1xf32> to vector<1xf32>
      %68 = vector.shape_cast %67 : vector<1xf32> to vector<1x1x1xf32>
      %69 = vector.extract %68[0, 0, 0] : f32 from vector<1x1x1xf32>
      %c0_33 = arith.constant 0 : index
      %c0_34 = arith.constant 0 : index
      %70 = memref.load %arg5[%c0_33, %c0_34] : memref<1x3xf32, #tpu.memory_space<smem>>
      memref.store %69, %arg5[%c0_33, %c0_34] : memref<1x3xf32, #tpu.memory_space<smem>>
      %c0_35 = arith.constant 0 : index
      %c0_36 = arith.constant 0 : index
      %71 = vector.load %arg7[%c0_35, %c0_36] : memref<24x1xf32, #tpu.memory_space<vmem>>, vector<24x1xf32>
      %72 = vector.shape_cast %71 : vector<24x1xf32> to vector<1x24x1xf32>
      %cst_37 = arith.constant dense<0.000000e+00> : vector<1xf32>
      %73 = vector.multi_reduction <add>, %72, %cst_37 [1, 2] : vector<1x24x1xf32> to vector<1xf32>
      %74 = vector.shape_cast %73 : vector<1xf32> to vector<1x1x1xf32>
      %75 = vector.extract %74[0, 0, 0] : f32 from vector<1x1x1xf32>
      %c0_38 = arith.constant 0 : index
      %c1 = arith.constant 1 : index
      %76 = memref.load %arg5[%c0_38, %c1] : memref<1x3xf32, #tpu.memory_space<smem>>
      memref.store %75, %arg5[%c0_38, %c1] : memref<1x3xf32, #tpu.memory_space<smem>>
      %c0_39 = arith.constant 0 : index
      %c0_40 = arith.constant 0 : index
      %77 = vector.load %arg8[%c0_39, %c0_40] : memref<24x1xf32, #tpu.memory_space<vmem>>, vector<24x1xf32>
      %78 = vector.shape_cast %77 : vector<24x1xf32> to vector<1x24x1xf32>
      %cst_41 = arith.constant dense<0.000000e+00> : vector<1xf32>
      %79 = vector.multi_reduction <add>, %78, %cst_41 [1, 2] : vector<1x24x1xf32> to vector<1xf32>
      %80 = vector.shape_cast %79 : vector<1xf32> to vector<1x1x1xf32>
      %81 = vector.extract %80[0, 0, 0] : f32 from vector<1x1x1xf32>
      %c0_42 = arith.constant 0 : index
      %c2 = arith.constant 2 : index
      %82 = memref.load %arg5[%c0_42, %c2] : memref<1x3xf32, #tpu.memory_space<smem>>
      memref.store %81, %arg5[%c0_42, %c2] : memref<1x3xf32, #tpu.memory_space<smem>>
    } else {
    }
    return
  }
  func.func @transform_0(%arg0: i32, %arg1: i32) -> (i32, i32) {
    %c1_i32 = arith.constant 1 : i32
    %0 = arith.muli %arg0, %c1_i32 : i32
    %1 = arith.addi %0, %arg1 : i32
    %c0_i32 = arith.constant 0 : i32
    %2 = arith.minsi %1, %c0_i32 : i32
    %c0_i32_0 = arith.constant 0 : i32
    %c0_i32_1 = arith.constant 0 : i32
    return %2, %c0_i32_0 : i32, i32
  }
  func.func @transform_1(%arg0: i32, %arg1: i32) -> (i32, i32) {
    %c1_i32 = arith.constant 1 : i32
    %0 = arith.muli %arg0, %c1_i32 : i32
    %1 = arith.addi %0, %arg1 : i32
    %c0_i32 = arith.constant 0 : i32
    %2 = arith.minsi %1, %c0_i32 : i32
    %c0_i32_0 = arith.constant 0 : i32
    %c0_i32_1 = arith.constant 0 : i32
    return %2, %c0_i32_0 : i32, i32
  }
  func.func @transform_2(%arg0: i32, %arg1: i32) -> (i32, i32) {
    %c0_i32 = arith.constant 0 : i32
    %c0_i32_0 = arith.constant 0 : i32
    %c0_i32_1 = arith.constant 0 : i32
    return %c0_i32, %c0_i32_0 : i32, i32
  }
  func.func @transform_3(%arg0: i32, %arg1: i32) -> (i32, i32) {
    %c0_i32 = arith.constant 0 : i32
    %c0_i32_0 = arith.constant 0 : i32
    return %arg0, %c0_i32 : i32, i32
  }
}

</mosaic_0001>

<bundles_post_ra>
// kernel: tpu_custom_call.1
= control target key start
LH: loop header
LB: loop body
LE: loop exit
PB: predicated region body
PF: predicated region fallthrough
CT: control target
= control target key end

     0   :  { %vm126_vm0 = vcmask 261120   ;;  %s612_s0 = inlined_call_operand.vmem [shape: f32[24,32], index: 0, kind: input, shape index: {}]   ;;  %s613_s1 = inlined_call_operand.vmem [shape: s32[24,1], index: 1, kind: input, shape index: {}]   ;;  %s614_s2 = inlined_call_operand.vmem [shape: f32[1,32], index: 2, kind: input, shape index: {}]   ;;  %s615_s3 = inlined_call_operand.hbm [shape: f32[1,3], index: 3, kind: output, shape index: {}]  }
   0x1   :  { %v447_v0 = vld [vmem:[%s612_s0] sm:$0xff]  ;;  %v452_v1 = vld [vmem:[%s612_s0 + $0x8] sm:$0xff]  ;;  %v457_v2 = vld [vmem:[%s612_s0 + $0x10] sm:$0xff] }
   0x2   :  { %v127_v3 = vsel %vm126_vm0, %v447_v0, -inf  ;;  %v133_v4 = vsel %vm126_vm0, %v457_v2, -inf }
   0x3   :  { %8 = vsyncpa [#allocation6], 0  ;;  %128 = vmax.xlane.f32.xlu0 %v127_v3  ;;  %134 = vmax.xlane.f32.xlu1 %v133_v4  ;;  %v130_v5 = vsel %vm126_vm0, %v452_v1, -inf  ;;  %v421_v6 = vmov 0   ;;  %v112_v7 = vlaneseq  ;;  %v494_v19 = vld [vmem:[%s613_s1 + $0x8] sm:$0xff]  ;;  %v500_v20 = vld [vmem:[%s613_s1] sm:$0xff] }
   0x4   :  { %396 = vset.pattern.permute.xlu1 %v421_v6  ;;  %395 = vset.pattern.permute.xlu0 %v421_v6  ;;  %v515_v30 = vld [vmem:[%s613_s1 + $0x10] sm:$0xff]  ;;  %v382_v41 = vld [vmem:[%s614_s2] ss:$0 sm:$0xff]  ;;  %vm83_vm6 = vcmask 7168   ;;  %v422_v50 = vmov 0.0   ;;  %s409_s28 = scalar_lea.hbm %s615_s3, 16 }
   0x5   :  { %v465_v8 = vand.u32 127, %v112_v7  ;;  %84 = vst.msk [vmem:[#allocation2] sm:$0xff] %vm83_vm6, %v422_v50  ;;  %87 = vst.msk [vmem:[#allocation3] sm:$0xff] %vm83_vm6, %v422_v50  ;;  %p410_p0 = scmp.ne.s32.totalorder %s615_s3, %s409_s28  ;;  %p413_p1 = scmp.lt.u32.totalorder %s409_s28, %s615_s3 }
   0x6   :  { %85 = vst.msk [vmem:[#allocation2 + $0x8] sm:$0xff] %vm83_vm6, %v422_v50  ;;  %86 = vst.msk [vmem:[#allocation2 + $0x10] sm:$0xff] %vm83_vm6, %v422_v50 }
   0x7   :  { %131 = vmax.xlane.f32.xlu0 %v130_v5  ;;  %88 = vst.msk [vmem:[#allocation3 + $0x8] sm:$0xff] %vm83_vm6, %v422_v50  ;;  %89 = vst.msk [vmem:[#allocation3 + $0x10] sm:$0xff] %vm83_vm6, %v422_v50  ;;  %p415_p2 = pnand %p413_p1, %p410_p0 }
   0x8   :  { %90 = vst.msk [vmem:[#allocation4] sm:$0xff] %vm83_vm6, %v422_v50  ;;  %91 = vst.msk [vmem:[#allocation4 + $0x8] sm:$0xff] %vm83_vm6, %v422_v50 }
   0x9   :  { %92 = vst.msk [vmem:[#allocation4 + $0x10] sm:$0xff] %vm83_vm6, %v422_v50 }
  0x90   :  { %v467_v9 = vpop.xlane.xlu0 %128  ;;  %v503_v21 = vpop.xlane.xlu1 %134 }
  0x91   :  { %vm197_vm1 = vcmp.eq.f32.partialorder %v447_v0, %v467_v9  ;;  %vm199_vm3 = vcmp.eq.f32.partialorder %v457_v2, %v503_v21  ;;  %v136_v31 = vsub.f32 %v447_v0, %v467_v9  ;;  %v138_v35 = vsub.f32 %v457_v2, %v503_v21 }
  0x92   :  { %v200_v10 = vsel %vm197_vm1, %v465_v8, 32  ;;  %v202_v24 = vsel %vm199_vm3, %v465_v8, 32 }
  0x93   :  { %v473_v11 = vsel %vm126_vm0, %v200_v10, 2147483647  ;;  %v233_v25 = vsel %vm126_vm0, %v202_v24, 2147483647  ;;  %v139_v32 = vmul.f32 1.442695, %v136_v31 }
  0x94   :  { %v475_v12 = vpop.xlane.xlu0 %131  ;;  %v205_v13 = vshra.s32 %v473_v11, 16  ;;  %v235_v26 = vshra.s32 %v233_v25, 16  ;;  %v143_v37 = vmul.f32 1.442695, %v138_v35  ;;  %v234_v51 = vand.u32 65535, %v233_v25  ;;  %v273_v10 = vld [vmem:[#allocation3] sm:$0xff] }
  0x95   :  { %vm198_vm2 = vcmp.eq.f32.partialorder %v452_v1, %v475_v12  ;;  %v137_v22 = vsub.f32 %v452_v1, %v475_v12  ;;  %v204_v56 = vand.u32 65535, %v473_v11  ;;  %v275_v31 = vld [vmem:[#allocation3 + $0x10] sm:$0xff] }
  0x96   :  { %v480_v14 = vcvt.s32.f32 %v205_v13  ;;  %v201_v15 = vsel %vm198_vm2, %v465_v8, 32  ;;  %v237_v27 = vcvt.s32.f32 %v235_v26  ;;  %v236_v53 = vcvt.s32.f32 %v234_v51  ;;  %v285_v51 = vld [vmem:[#allocation4] sm:$0xff] }
  0x97   :  { %v484_v16 = vsel %vm126_vm0, %v201_v15, 2147483647  ;;  %v141_v23 = vmul.f32 1.442695, %v137_v22  ;;  %v206_v61 = vcvt.s32.f32 %v204_v56 }
  0x98   :  { %208 = vmin.xlane.f32.xlu1 %v480_v14  ;;  %v220_v17 = vshra.s32 %v484_v16, 16  ;;  %v219_v62 = vand.u32 65535, %v484_v16 }
  0x99   :  { %397 = vpow2.f32 %v141_v23 }
  0x9a   :  { %v488_v18 = vcvt.s32.f32 %v220_v17  ;;  %399 = vpow2.f32 %v139_v32  ;;  %v257_v17 = vld [vmem:[#allocation2] sm:$0xff] }
  0x9b   :  { %401 = vpow2.f32 %v143_v37  ;;  %v287_v32 = vld [vmem:[#allocation4 + $0x10] sm:$0xff] }
  0x9c   :  { %223 = vmin.xlane.f32.xlu0 %v488_v18 }
  0xa3   :  { %v398_v28 = vpop.eup %397 }
  0xa4   :  { %v148_v29 = vsel %vm126_vm0, %v398_v28, 0.0  ;;  %v400_v33 = vpop.eup %399 }
  0xa5   :  { %v145_v34 = vsel %vm126_vm0, %v400_v33, 0.0  ;;  %v402_v48 = vpop.eup %401 }
  0xa6   :  { %v151_v49 = vsel %vm126_vm0, %v402_v48, 0.0 }
  0xa9   :  { %118 = vperm.xlu1 %396, %v494_v19  }
  0xb2   :  { %115 = vperm.xlu0 %395, %v500_v20  }
  0xcd   :  { %238 = vmin.xlane.f32.xlu1 %v237_v27 }
  0xd1   :  { %149 = vadd.xlane.f32.xlu0 %v148_v29 }
  0xde   :  { %121 = vperm.xlu1 %396, %v515_v30  }
 0x102   :  { %146 = vadd.xlane.f32.xlu1 %v145_v34 }
 0x125   :  { %v523_v36 = vpop.xlane.xlu1 %208 }
 0x126   :  { %vm210_vm9 = vcmp.eq.f32.partialorder %v480_v14, %v523_v36  ;;  %v215_v34 = vcvt.f32.s32 %v523_v36 }
 0x127   :  { %v211_v63 = vsel %vm210_vm9, %v206_v61, inf }
 0x129   :  { %v525_v38 = vpop.xlane.xlu0 %223  ;;  %v119_v39 = vpop.permute.xlu1 %118 }
 0x12a   :  { %vm124_vm4 = vcmp.eq.s32.totalorder %v465_v8, %v119_v39  ;;  %vm225_vm10 = vcmp.eq.f32.partialorder %v488_v18, %v525_v38  ;;  %v230_v36 = vcvt.f32.s32 %v525_v38 }
 0x12b   :  { %v164_v46 = vsel %vm124_vm4, %v452_v1, 0.0 }
 0x12c   :  { %v169_v47 = vsel %vm126_vm0, %v164_v46, 0.0  ;;  %v216_v46 = vshll.u32 %v215_v34, 16 }
 0x131   :  { %v116_v40 = vpop.permute.xlu0 %115 }
 0x132   :  { %vm123_vm5 = vcmp.eq.s32.totalorder %v465_v8, %v116_v40 }
 0x133   :  { %v163_v42 = vsel %vm123_vm5, %v447_v0, 0.0  ;;  %v185_v43 = vsel %vm123_vm5, %v382_v41, 0.0  ;;  %v221_v0 = vcvt.s32.f32 %v219_v62  ;;  %v258_v62 = vld [vmem:[#allocation2 + $0x8] sm:$0xff] }
 0x134   :  { %v166_v44 = vsel %vm126_vm0, %v163_v42, 0.0  ;;  %v188_v45 = vsel %vm126_vm0, %v185_v43, 0.0 }
 0x135   :  { %167 = vadd.xlane.f32.xlu1 %v166_v44  ;;  %189 = vadd.xlane.f32.xlu0 %v188_v45  ;;  %v226_v1 = vsel %vm225_vm10, %v221_v0, inf  ;;  %v259_v44 = vld [vmem:[#allocation2 + $0x10] sm:$0xff] }
 0x139   :  { %170 = vadd.xlane.f32.xlu1 %v169_v47 }
 0x13d   :  { %152 = vadd.xlane.f32.xlu1 %v151_v49 }
 0x15a   :  { %v239_v52 = vpop.xlane.xlu1 %238 }
 0x15b   :  { %vm240_vm7 = vcmp.eq.f32.partialorder %v237_v27, %v239_v52  ;;  %v245_v25 = vcvt.f32.s32 %v239_v52 }
 0x15c   :  { %v241_v54 = vsel %vm240_vm7, %v236_v53, inf  ;;  %v231_v53 = vshll.u32 %v230_v36, 16 }
 0x15d   :  { %242 = vmin.xlane.f32.xlu0 %v241_v54 }
 0x15e   :  { %v122_v55 = vpop.permute.xlu1 %121  ;;  %v150_v7 = vpop.xlane.xlu0 %149 }
 0x15f   :  { %vm125_vm8 = vcmp.eq.s32.totalorder %v465_v8, %v122_v55 }
 0x160   :  { %v165_v57 = vsel %vm125_vm8, %v457_v2, 0.0  ;;  %v187_v58 = vsel %vm125_vm8, %v382_v41, 0.0  ;;  %v186_v2 = vsel %vm124_vm4, %v382_v41, 0.0 }
 0x161   :  { %v172_v59 = vsel %vm126_vm0, %v165_v57, 0.0  ;;  %v194_v60 = vsel %vm126_vm0, %v187_v58, 0.0  ;;  %v191_v3 = vsel %vm126_vm0, %v186_v2, 0.0  ;;  %v274_v57 = vld [vmem:[#allocation3 + $0x8] sm:$0xff] }
 0x162   :  { %173 = vadd.xlane.f32.xlu1 %v172_v59  ;;  %195 = vadd.xlane.f32.xlu0 %v194_v60  ;;  %v286_v60 = vld [vmem:[#allocation4 + $0x8] sm:$0xff] }
 0x166   :  { %212 = vmin.xlane.f32.xlu1 %v211_v63 }
 0x16a   :  { %227 = vmin.xlane.f32.xlu1 %v226_v1 }
 0x16e   :  { %192 = vadd.xlane.f32.xlu1 %v191_v3 }
 0x18f   :  { %v147_v4 = vpop.xlane.xlu1 %146 }
 0x190   :  { %403 = vlog2.f32 %v147_v4 }
 0x19a   :  { %v404_v5 = vpop.eup %403 }
 0x19b   :  { %v155_v6 = vmul.f32 0.6931472, %v404_v5 }
 0x19d   :  { %v160_v11 = vadd.f32 %v155_v6, %v467_v9  ;;  %v246_v9 = vshll.u32 %v245_v25, 16 }
 0x1c2   :  { %v168_v13 = vpop.xlane.xlu1 %167  ;;  %v190_v14 = vpop.xlane.xlu0 %189 }
 0x1c3   :  { %v175_v15 = vsub.f32 %v160_v11, %v168_v13  ;;  %v279_v16 = vadd.f32 %v273_v10, %v190_v14 }
 0x1c5   :  { %v260_v18 = vmul.f32 %v190_v14, %v175_v15  ;;  %282 = vst.msk [vmem:[#allocation3] sm:$0xff] %vm83_vm6, %v279_v16 }
 0x1c6   :  { %v171_v22 = vpop.xlane.xlu1 %170 }
 0x1c7   :  { %v266_v8 = vadd.f32 %v260_v18, %v257_v17 }
 0x1c9   :  { %270 = vst.msk [vmem:[#allocation2] sm:$0xff] %vm83_vm6, %v266_v8 }
 0x1ca   :  { %v153_v23 = vpop.xlane.xlu1 %152 }
 0x1cb   :  { %405 = vlog2.f32 %v153_v23 }
 0x1cc   :  { %407 = vlog2.f32 %v150_v7  ;;  %v319_v2 = vld [vmem:[#allocation3] sm:$0xff] }
 0x1cd   :  { %v322_v6 = vsel %vm83_vm6, %v319_v2, 0.0 }
 0x1d0   :  { %v300_v5 = vld [vmem:[#allocation2] sm:$0xff] }
 0x1d1   :  { %v303_v15 = vsel %vm83_vm6, %v300_v5, 0.0 }
 0x1d5   :  { %v406_v24 = vpop.eup %405 }
 0x1d6   :  { %v159_v26 = vmul.f32 0.6931472, %v406_v24  ;;  %v408_v42 = vpop.eup %407 }
 0x1d7   :  { %v157_v47 = vmul.f32 0.6931472, %v408_v42 }
 0x1d8   :  { %v162_v33 = vadd.f32 %v159_v26, %v503_v21 }
 0x1d9   :  { %v161_v54 = vadd.f32 %v157_v47, %v475_v12 }
 0x1db   :  { %v176_v58 = vsub.f32 %v161_v54, %v171_v22 }
 0x1ea   :  { %v243_v27 = vpop.xlane.xlu0 %242 }
 0x1eb   :  { %v244_v28 = vcvt.f32.s32 %v243_v27 }
 0x1ed   :  { %v247_v29 = vadd.s32 %v246_v9, %v244_v28 }
 0x1ef   :  { %vm250_vm11 = vcmp.eq.s32.totalorder %v247_v29, %v515_v30  ;;  %v174_v35 = vpop.xlane.xlu1 %173  ;;  %v196_v37 = vpop.xlane.xlu0 %195 }
 0x1f0   :  { %v385_v39 = vsel %vm250_vm11, 1.0, %v422_v50  ;;  %v177_v40 = vsub.f32 %v162_v33, %v174_v35  ;;  %v281_v41 = vadd.f32 %v275_v31, %v196_v37 }
 0x1f1   :  { %v293_v43 = vadd.f32 %v385_v39, %v287_v32 }
 0x1f2   :  { %v262_v45 = vmul.f32 %v196_v37, %v177_v40  ;;  %284 = vst.msk [vmem:[#allocation3 + $0x10] sm:$0xff] %vm83_vm6, %v281_v41 }
 0x1f3   :  { %296 = vst.msk [vmem:[#allocation4 + $0x10] sm:$0xff] %vm83_vm6, %v293_v43  ;;  %v213_v21 = vpop.xlane.xlu1 %212 }
 0x1f4   :  { %v268_v30 = vadd.f32 %v262_v45, %v259_v44  ;;  %v214_v48 = vcvt.f32.s32 %v213_v21 }
 0x1f6   :  { %272 = vst.msk [vmem:[#allocation2 + $0x10] sm:$0xff] %vm83_vm6, %v268_v30  ;;  %v217_v49 = vadd.s32 %v216_v46, %v214_v48 }
 0x1f7   :  { %v228_v52 = vpop.xlane.xlu1 %227 }
 0x1f8   :  { %vm248_vm12 = vcmp.eq.s32.totalorder %v217_v49, %v500_v20  ;;  %v229_v55 = vcvt.f32.s32 %v228_v52 }
 0x1f9   :  { %v383_v56 = vsel %vm248_vm12, 1.0, %v422_v50  ;;  %v321_v4 = vld [vmem:[#allocation3 + $0x10] sm:$0xff] }
 0x1fa   :  { %v291_v59 = vadd.f32 %v383_v56, %v285_v51  ;;  %v232_v38 = vadd.s32 %v231_v53, %v229_v55  ;;  %v325_v14 = vsel %vm83_vm6, %v321_v4, 0.0  ;;  %v340_v25 = vld [vmem:[#allocation4 + $0x10] sm:$0xff] }
 0x1fb   :  { %v193_v61 = vpop.xlane.xlu1 %192  ;;  %v344_v27 = vsel %vm83_vm6, %v340_v25, 0.0 }
 0x1fc   :  { %294 = vst.msk [vmem:[#allocation4] sm:$0xff] %vm83_vm6, %v291_v59  ;;  %vm249_vm13 = vcmp.eq.s32.totalorder %v232_v38, %v494_v19  ;;  %v261_v63 = vmul.f32 %v193_v61, %v176_v58  ;;  %v280_v0 = vadd.f32 %v274_v57, %v193_v61 }
 0x1fd   :  { %v384_v12 = vsel %vm249_vm13, 1.0, %v422_v50  ;;  %v302_v7 = vld [vmem:[#allocation2 + $0x10] sm:$0xff] }
 0x1fe   :  { %v292_v1 = vadd.f32 %v384_v12, %v286_v60  ;;  %v267_v20 = vadd.f32 %v261_v63, %v258_v62  ;;  %283 = vst.msk [vmem:[#allocation3 + $0x8] sm:$0xff] %vm83_vm6, %v280_v0  ;;  %v306_v22 = vsel %vm83_vm6, %v302_v7, 0.0 }
 0x200   :  { %295 = vst.msk [vmem:[#allocation4 + $0x8] sm:$0xff] %vm83_vm6, %v292_v1  ;;  %271 = vst.msk [vmem:[#allocation2 + $0x8] sm:$0xff] %vm83_vm6, %v267_v20 }
 0x203   :  { %v338_v50 = vld [vmem:[#allocation4] sm:$0xff] }
 0x204   :  { %v341_v23 = vsel %vm83_vm6, %v338_v50, 0.0 }
 0x205   :  { %v320_v3 = vld [vmem:[#allocation3 + $0x8] sm:$0xff] }
 0x206   :  { %v323_v19 = vsel %vm83_vm6, %v320_v3, 0.0 }
 0x207   :  { %v324_v10 = vadd.f32 %v323_v19, %v322_v6  ;;  %v301_v11 = vld [vmem:[#allocation2 + $0x8] sm:$0xff]  ;;  %v339_v13 = vld [vmem:[#allocation4 + $0x8] sm:$0xff] }
 0x208   :  { %v304_v16 = vsel %vm83_vm6, %v301_v11, 0.0  ;;  %v342_v17 = vsel %vm83_vm6, %v339_v13, 0.0 }
 0x209   :  { %v326_v18 = vadd.f32 %v325_v14, %v324_v10  ;;  %v305_v8 = vadd.f32 %v304_v16, %v303_v15  ;;  %v343_v26 = vadd.f32 %v342_v17, %v341_v23 }
 0x20b   :  { %327 = vadd.xlane.f32.xlu0 %v326_v18  ;;  %v307_v24 = vadd.f32 %v306_v22, %v305_v8  ;;  %v345_v9 = vadd.f32 %v344_v27, %v343_v26 }
 0x20d   :  { %308 = vadd.xlane.f32.xlu1 %v307_v24 }
 0x211   :  { %346 = vadd.xlane.f32.xlu1 %v345_v9 }
 0x298   :  { %v328_v28 = vpop.xlane.xlu0 %327 }
 0x299   :  { %v329_v29 = vrot.slane %v328_v28, 4 }
 0x29a   :  { %v309_v31 = vpop.xlane.xlu1 %308 }
 0x29b   :  { %v330_v32 = vadd.f32 %v329_v29, %v328_v28  ;;  %v310_v33 = vrot.slane %v309_v31, 4 }
 0x29d   :  { %v331_v34 = vrot.slane %v330_v32, 2  ;;  %v311_v35 = vadd.f32 %v310_v33, %v309_v31 }
 0x29e   :  { %v347_v37 = vpop.xlane.xlu1 %346 }
 0x29f   :  { %v332_v39 = vadd.f32 %v331_v34, %v330_v32  ;;  %v312_v40 = vrot.slane %v311_v35, 2  ;;  %v348_v41 = vrot.slane %v347_v37, 4 }
 0x2a1   :  { %v349_v42 = vadd.f32 %v348_v41, %v347_v37  ;;  %v313_v43 = vadd.f32 %v312_v40, %v311_v35  ;;  %v333_v44 = vrot.slane %v332_v39, 1 }
 0x2a3   :  { %v350_v45 = vrot.slane %v349_v42, 2  ;;  %v314_v46 = vrot.slane %v313_v43, 1  ;;  %v334_v47 = vadd.f32 %v333_v44, %v332_v39 }
 0x2a5   :  { %v351_v21 = vadd.f32 %v350_v45, %v349_v42  ;;  %v315_v36 = vadd.f32 %v314_v46, %v313_v43 }
 0x2a7   :  { %386 = vpush %v315_v36  ;;  %v352_v30 = vrot.slane %v351_v21, 1 }
 0x2a8   :  { %388 = vpush %v334_v47 }
 0x2a9   :  { %v353_v48 = vadd.f32 %v352_v30, %v351_v21 }
 0x2ab   :  { %390 = vpush %v353_v48 }
 0x2d8   :  { %s387_s2 = spop %386 }
 0x2d9   :  { %318 = sst [smem:[#allocation5]] %s387_s2  ;;  %s389_s24 = spop %388 }
 0x2da   :  { %337 = sst [smem:[#allocation5 + $0x1]] %s389_s24 }
 0x2dc   :  { %s391_s25 = spop %390 }
 0x2dd   :  { %356 = sst [smem:[#allocation5 + $0x2]] %s391_s25 }
 0x2de   :  { %418 = shalt.err (!%p415_p2)
}
 0x2df   :  { %s423_s6 = smov [#allocation5]  }
 0x2e0   :  { %364 = dma.smem_to_hbm %s423_s6, 16, %s615_s3, [#allocation6]  }
 0x2e1   :  { %419 = dma.done.wait [#allocation6], 16  }
 0x2e2   :  { %420 = vsyncadd [#allocation6], 4294967280 }
 0x2e3   :  { %368 = sfence }
 0x2e4   :  { %369 = vsyncpa [#allocation6], 1 }

</bundles_post_ra>
